<compile_context>
chip_gen: v5e
topology: v5e:2x2
jax: 0.10.0
libtpu: 0.0.40
codegen_flags: <defaults>
</compile_context>

<pallas_src>
import jax
import jax.numpy as jnp
from jax.experimental import pallas as pl
from jax.experimental.pallas import tpu as pltpu

_BIG = jnp.float32(3.0e38)  # sentinel bias for the padded layer-3 output lanes


def pack_params(params, a_dim, s_dim, hidden):
    """Fuse the two Q heads into one packed weight buffer + one bias buffer."""
    (w1a, b1a, w2a, b2a, w3a, b3a,
     w1b, b1b, w2b, b2b, w3b, b3b) = params
    h = hidden
    h2 = 2 * h

    # Layer 1: (D_in, 2H) -- heads side by side.
    w1 = jnp.concatenate([w1a, w1b], axis=1)
    # Layer 2: block-diagonal (2H, 2H) keeps the two heads independent.
    w2 = jnp.zeros((h2, h2), jnp.float32)
    w2 = w2.at[:h, :h].set(w2a).at[h:, h:].set(w2b)
    # Layer 3: (2H, 2H), only columns 0 (head A) and 1 (head B) are non-zero.
    w3 = jnp.zeros((h2, h2), jnp.float32)
    w3 = w3.at[:h, 0:1].set(w3a).at[h:, 1:2].set(w3b)

    w_pack = jnp.concatenate([w1, w2, w3], axis=0)  # (D_in + 4H, 2H)

    b1 = jnp.concatenate([b1a, b1b], axis=1)        # (1, 2H)
    b2 = jnp.concatenate([b2a, b2b], axis=1)        # (1, 2H)
    # Padded layer-3 lanes get +BIG so min over all lanes == min(q1, q2).
    b3 = jnp.full((1, h2), _BIG, jnp.float32)
    b3 = b3.at[0, 0].set(b3a[0, 0]).at[0, 1].set(b3b[0, 0])
    b_pack = jnp.concatenate([b1, b2, b3], axis=0)  # (3, 2H)

    return w_pack, b_pack


def gp_critic_forward(action, state, packed_params, hidden):
    """Pallas implementation of GPCritic.forward (== DoubleQNetwork min-Q)."""
    w_pack, b_pack = packed_params
    action = action.astype(jnp.float32)
    state = state.astype(jnp.float32)

    B, a_dim = action.shape
    _, s_dim = state.shape
    d_in = a_dim + s_dim
    h2 = 2 * hidden
    assert w_pack.shape == (d_in + 2 * h2, h2)
    assert b_pack.shape == (3, h2)

    # Batch tiling: keep whole batch in one block when small; tile by 512
    # (multiple of 8, comfortably under scoped VMEM even on v7x) when large.
    tile_b = B if B <= 512 else 512
    grid = (pl.cdiv(B, tile_b),)

    def kernel(act_ref, st_ref, w_ref, b_ref, out_ref):
        a = act_ref[...]
        s = st_ref[...]

        # Static, sublane-aligned views into the packed weight buffer.
        w1a = w_ref[0:a_dim, :]
        w1s = w_ref[a_dim:d_in, :]
        w2 = w_ref[d_in:d_in + h2, :]
        w3 = w_ref[d_in + h2:d_in + 2 * h2, :]

        b = b_ref[...]
        b1 = b[0:1, :]
        b2 = b[1:2, :]
        b3 = b[2:3, :]

        # Layer 1 (concat-free): x @ W1 == action @ W1[:A] + state @ W1[A:]
        hdd = (jnp.dot(a, w1a, preferred_element_type=jnp.float32)
               + jnp.dot(s, w1s, preferred_element_type=jnp.float32)
               + b1)
        hdd = jnp.maximum(hdd, 0.0)
        # Layer 2 (block-diagonal -> two heads stay independent)
        hdd = jnp.dot(hdd, w2, preferred_element_type=jnp.float32) + b2
        hdd = jnp.maximum(hdd, 0.0)
        # Layer 3: lanes 0/1 = q1/q2, remaining lanes = +BIG (padding bias).
        q = jnp.dot(hdd, w3, preferred_element_type=jnp.float32) + b3
        # min over lanes == min(q1, q2)
        out_ref[...] = jnp.min(q, axis=-1, keepdims=True)

    flops = 2 * B * (d_in * h2 + h2 * h2 + h2 * 2)
    bytes_accessed = 4 * (B * d_in + B + w_pack.size + b_pack.size)
    cost = pl.CostEstimate(flops=int(flops), transcendentals=0,
                           bytes_accessed=int(bytes_accessed))

    out = pl.pallas_call(
        kernel,
        out_shape=jax.ShapeDtypeStruct((B, 1), jnp.float32),
        grid=grid,
        in_specs=[
            pl.BlockSpec((tile_b, a_dim), lambda i: (i, 0)),          # action tile
            pl.BlockSpec((tile_b, s_dim), lambda i: (i, 0)),          # state tile
            pl.BlockSpec(w_pack.shape, lambda i: (0, 0)),             # resident weights
            pl.BlockSpec(b_pack.shape, lambda i: (0, 0)),             # resident biases
        ],
        out_specs=pl.BlockSpec((tile_b, 1), lambda i: (i, 0)),
        compiler_params=pltpu.CompilerParams(
            dimension_semantics=("parallel",)),
        cost_estimate=cost,
    )(action, state, w_pack, b_pack)
    return out


def init_params(key, a_dim, s_dim, hidden):
    """Deterministic parameter init for the two Q MLPs (weights feature-major)."""
    in_dim = a_dim + s_dim
    ks = jax.random.split(key, 6)

    def lin(kw, fan_in, fan_out):
        w = jax.random.normal(kw, (fan_in, fan_out), jnp.float32) * (1.0 / jnp.sqrt(fan_in))
        b = jnp.zeros((1, fan_out), jnp.float32)
        return w, b

    # Q head A
    w1a, b1a = lin(ks[0], in_dim, hidden)
    w2a, b2a = lin(ks[1], hidden, hidden)
    w3a, b3a = lin(ks[2], hidden, 1)
    # Q head B
    w1b, b1b = lin(ks[3], in_dim, hidden)
    w2b, b2b = lin(ks[4], hidden, hidden)
    w3b, b3b = lin(ks[5], hidden, 1)

    return (w1a, b1a, w2a, b2a, w3a, b3a,
            w1b, b1b, w2b, b2b, w3b, b3b)


def reference_forward(action, state, params):
    """Pure-JAX reference (unfused, with concat) for correctness check."""
    (w1a, b1a, w2a, b2a, w3a, b3a,
     w1b, b1b, w2b, b2b, w3b, b3b) = params
    x = jnp.concatenate([action, state], axis=-1).astype(jnp.float32)

    def mlp(w1, b1, w2, b2, w3, b3):
        h = jnp.maximum(x @ w1 + b1, 0.0)
        h = jnp.maximum(h @ w2 + b2, 0.0)
        return h @ w3 + b3

    return jnp.minimum(mlp(w1a, b1a, w2a, b2a, w3a, b3a),
                       mlp(w1b, b1b, w2b, b2b, w3b, b3b))


if __name__ == "__main__":
    key = jax.random.PRNGKey(0)
    k_act, k_state, k_params = jax.random.split(key, 3)

    B = 8            # batch
    A_DIM = 8        # action dim
    S_DIM = 24       # state dim
    HIDDEN = 32      # hidden width of each Q MLP

    action = jax.random.normal(k_act, (B, A_DIM), jnp.float32)
    state = jax.random.normal(k_state, (B, S_DIM), jnp.float32)

    raw_params = init_params(k_params, A_DIM, S_DIM, HIDDEN)
    packed = pack_params(raw_params, A_DIM, S_DIM, HIDDEN)

    out = gp_critic_forward(action, state, packed, HIDDEN)
    out = jax.block_until_ready(out)

    ref = reference_forward(action, state, raw_params)
    assert out.shape == (B, 1)
    assert jnp.allclose(out, ref, atol=1e-5, rtol=1e-5)

    # TODO(synk): q_target deep-copy and training-only losses (q_loss, v_loss,
    # iql_q_loss) are optimizer-side paths, not part of forward(); only the
    # forward min-Q pass is kernelized.  bf16 activation casting for large-batch
    # v6e serving is left out to keep exact f32 numerics here.
    print("KERNEL_OK")
</pallas_src>

<mosaic_0001>
module attributes {stable_mosaic.version = 11 : i64} {
  func.func @kernel(%arg0: i32, %arg1: memref<8x8xf32, #tpu.memory_space<vmem>>, %arg2: memref<8x24xf32, #tpu.memory_space<vmem>>, %arg3: memref<160x64xf32, #tpu.memory_space<vmem>>, %arg4: memref<3x64xf32, #tpu.memory_space<vmem>>, %arg5: memref<8x1xf32, #tpu.memory_space<vmem>>) attributes {dimension_semantics = [#tpu.dimension_semantics<parallel>], iteration_bounds = array<i64: 1>, scalar_prefetch = 0 : i64, scratch_operands = 0 : i64, tpu.core_type = #tpu.core_type<tc>, window_params = [{transform_indices = @transform_0, window_bounds = array<i64: 8, 8>}, {transform_indices = @transform_1, window_bounds = array<i64: 8, 24>}, {pipeline_mode = #tpu.pipeline_mode<synchronous>, transform_indices = @transform_2, window_bounds = array<i64: 160, 64>}, {pipeline_mode = #tpu.pipeline_mode<synchronous>, transform_indices = @transform_3, window_bounds = array<i64: 3, 64>}, {transform_indices = @transform_4, window_bounds = array<i64: 8, 1>}]} {
    %c0 = arith.constant 0 : index
    %c0_0 = arith.constant 0 : index
    %0 = vector.load %arg1[%c0, %c0_0] : memref<8x8xf32, #tpu.memory_space<vmem>>, vector<8x8xf32>
    %c0_1 = arith.constant 0 : index
    %c0_2 = arith.constant 0 : index
    %1 = vector.load %arg2[%c0_1, %c0_2] : memref<8x24xf32, #tpu.memory_space<vmem>>, vector<8x24xf32>
    %c0_3 = arith.constant 0 : index
    %c0_4 = arith.constant 0 : index
    %2 = vector.load %arg3[%c0_3, %c0_4] : memref<160x64xf32, #tpu.memory_space<vmem>>, vector<8x64xf32>
    %c8 = arith.constant 8 : index
    %c0_5 = arith.constant 0 : index
    %3 = vector.load %arg3[%c8, %c0_5] : memref<160x64xf32, #tpu.memory_space<vmem>>, vector<24x64xf32>
    %c32 = arith.constant 32 : index
    %c0_6 = arith.constant 0 : index
    %4 = vector.load %arg3[%c32, %c0_6] : memref<160x64xf32, #tpu.memory_space<vmem>>, vector<64x64xf32>
    %c96 = arith.constant 96 : index
    %c0_7 = arith.constant 0 : index
    %5 = vector.load %arg3[%c96, %c0_7] : memref<160x64xf32, #tpu.memory_space<vmem>>, vector<64x64xf32>
    %c0_8 = arith.constant 0 : index
    %c0_9 = arith.constant 0 : index
    %6 = vector.load %arg4[%c0_8, %c0_9] : memref<3x64xf32, #tpu.memory_space<vmem>>, vector<3x64xf32>
    %7 = vector.extract_strided_slice %6 {offsets = [0, 0], sizes = [1, 64], strides = [1, 1]} : vector<3x64xf32> to vector<1x64xf32>
    %8 = vector.extract_strided_slice %6 {offsets = [1, 0], sizes = [1, 64], strides = [1, 1]} : vector<3x64xf32> to vector<1x64xf32>
    %9 = vector.extract_strided_slice %6 {offsets = [2, 0], sizes = [1, 64], strides = [1, 1]} : vector<3x64xf32> to vector<1x64xf32>
    %cst = arith.constant dense<0.000000e+00> : vector<8x64xf32>
    %10 = tpu.matmul %0, %2, %cst {dimension_numbers = #tpu.dot_dimension_numbers<[1], [0], [0], [1], [0, 0, 1, 1], [], []>} : vector<8x8xf32>, vector<8x64xf32>, vector<8x64xf32> -> vector<8x64xf32>
    %cst_10 = arith.constant dense<0.000000e+00> : vector<8x64xf32>
    %11 = tpu.matmul %1, %3, %cst_10 {dimension_numbers = #tpu.dot_dimension_numbers<[1], [0], [0], [1], [0, 0, 1, 1], [], []>} : vector<8x24xf32>, vector<24x64xf32>, vector<8x64xf32> -> vector<8x64xf32>
    %12 = arith.addf %10, %11 : vector<8x64xf32>
    %13 = vector.broadcast %7 : vector<1x64xf32> to vector<8x64xf32>
    %14 = arith.addf %12, %13 : vector<8x64xf32>
    %cst_11 = arith.constant 0.000000e+00 : f32
    %15 = vector.broadcast %cst_11 : f32 to vector<8x64xf32>
    %16 = arith.maximumf %14, %15 : vector<8x64xf32>
    %cst_12 = arith.constant dense<0.000000e+00> : vector<8x64xf32>
    %17 = tpu.matmul %16, %4, %cst_12 {dimension_numbers = #tpu.dot_dimension_numbers<[1], [0], [0], [1], [0, 0, 1, 1], [], []>} : vector<8x64xf32>, vector<64x64xf32>, vector<8x64xf32> -> vector<8x64xf32>
    %18 = vector.broadcast %8 : vector<1x64xf32> to vector<8x64xf32>
    %19 = arith.addf %17, %18 : vector<8x64xf32>
    %cst_13 = arith.constant 0.000000e+00 : f32
    %20 = vector.broadcast %cst_13 : f32 to vector<8x64xf32>
    %21 = arith.maximumf %19, %20 : vector<8x64xf32>
    %cst_14 = arith.constant dense<0.000000e+00> : vector<8x64xf32>
    %22 = tpu.matmul %21, %5, %cst_14 {dimension_numbers = #tpu.dot_dimension_numbers<[1], [0], [0], [1], [0, 0, 1, 1], [], []>} : vector<8x64xf32>, vector<64x64xf32>, vector<8x64xf32> -> vector<8x64xf32>
    %23 = vector.broadcast %9 : vector<1x64xf32> to vector<8x64xf32>
    %24 = arith.addf %22, %23 : vector<8x64xf32>
    %cst_15 = arith.constant dense<0x7F800000> : vector<8xf32>
    %25 = vector.multi_reduction <minimumf>, %24, %cst_15 [1] : vector<8x64xf32> to vector<8xf32>
    %26 = vector.shape_cast %25 : vector<8xf32> to vector<8x1xf32>
    %c0_16 = arith.constant 0 : index
    %c0_17 = arith.constant 0 : index
    %27 = vector.load %arg5[%c0_16, %c0_17] : memref<8x1xf32, #tpu.memory_space<vmem>>, vector<8x1xf32>
    tpu.vector_store %arg5[%c0_16, %c0_17], %26 {strides = array<i32>} : memref<8x1xf32, #tpu.memory_space<vmem>>, vector<8x1xf32>,
    return
  }
  func.func @transform_0(%arg0: i32) -> (i32, i32) {
    %c0_i32 = arith.constant 0 : i32
    %c0_i32_0 = arith.constant 0 : i32
    return %arg0, %c0_i32 : i32, i32
  }
  func.func @transform_1(%arg0: i32) -> (i32, i32) {
    %c0_i32 = arith.constant 0 : i32
    %c0_i32_0 = arith.constant 0 : i32
    return %arg0, %c0_i32 : i32, i32
  }
  func.func @transform_2(%arg0: i32) -> (i32, i32) {
    %c0_i32 = arith.constant 0 : i32
    %c0_i32_0 = arith.constant 0 : i32
    %c0_i32_1 = arith.constant 0 : i32
    return %c0_i32, %c0_i32_0 : i32, i32
  }
  func.func @transform_3(%arg0: i32) -> (i32, i32) {
    %c0_i32 = arith.constant 0 : i32
    %c0_i32_0 = arith.constant 0 : i32
    %c0_i32_1 = arith.constant 0 : i32
    return %c0_i32, %c0_i32_0 : i32, i32
  }
  func.func @transform_4(%arg0: i32) -> (i32, i32) {
    %c0_i32 = arith.constant 0 : i32
    %c0_i32_0 = arith.constant 0 : i32
    return %arg0, %c0_i32 : i32, i32
  }
}

</mosaic_0001>

<bundles_post_ra>
// kernel: tpu_custom_call.1
= control target key start
LH: loop header
LB: loop body
LE: loop exit
PB: predicated region body
PF: predicated region fallthrough
CT: control target
= control target key end

     0   :  { %vm64_vm0 = vcmask 64512   ;;  %vm40_vm1 = vcmask 195584   ;;  %vm92_vm2 = vcmask 523264   ;;  %vm144_vm3 = vcmask 7168   ;;  %s254_s2 = inlined_call_operand.vmem [shape: f32[160,64], index: 2, kind: input, shape index: {}]   ;;  %s255_s0 = inlined_call_operand.vmem [shape: f32[8,8], index: 0, kind: input, shape index: {}]   ;;  %s256_s1 = inlined_call_operand.vmem [shape: f32[8,24], index: 1, kind: input, shape index: {}]   ;;  %s257_s3 = inlined_call_operand.vmem [shape: f32[3,64], index: 3, kind: input, shape index: {}]   ;;  %s258_s4 = inlined_call_operand.vmem [shape: f32[8,1], index: 4, kind: output, shape index: {}]  }
   0x1   :  { %v22_v0 = vld [vmem:[%s254_s2 + $0x18] sm:$0xff]  ;;  %v21_v1 = vld [vmem:[%s254_s2 + $0x10] sm:$0xff]  ;;  %v19_v2 = vld [vmem:[%s254_s2] sm:$0xff] }
   0x2   :  { %57 = vmatpush.msra.mxu0 %v22_v0  ;;  %v17_v3 = vld [vmem:[%s255_s0] sm:$0xff]  ;;  %v20_v4 = vld [vmem:[%s254_s2 + $0x8] sm:$0xff]  ;;  %83 = vmatpush.msra.mxu1 %v19_v2  ;;  %v30_v5 = vld [vmem:[%s254_s2 + $0x58] sm:$0xff] }
   0x3   :  { %v18_v6 = vld [vmem:[%s256_s1] sm:$0xff]  ;;  %151 = vmatmul.msk.f32.vlgmr.msra.gmra.mxu1 %vm64_vm0, %v17_v3  ;;  %v29_v7 = vld [vmem:[%s254_s2 + $0x50] sm:$0xff]  ;;  %104 = vmatpush.msra.mxu2 %v30_v5  ;;  %v28_v8 = vld [vmem:[%s254_s2 + $0x48] sm:$0xff] }
   0x4   :  { %58 = vmatpush.msra.mxu0 %v21_v1  ;;  %v27_v9 = vld [vmem:[%s254_s2 + $0x40] sm:$0xff]  ;;  %v26_v10 = vld [vmem:[%s254_s2 + $0x38] sm:$0xff]  ;;  %v25_v11 = vld [vmem:[%s254_s2 + $0x30] sm:$0xff] }
   0x5   :  { %105 = vmatpush.msra.mxu2 %v29_v7  ;;  %v24_v12 = vld [vmem:[%s254_s2 + $0x28] sm:$0xff]  ;;  %v23_v13 = vld [vmem:[%s254_s2 + $0x20] sm:$0xff]  ;;  %v38_v14 = vld [vmem:[%s254_s2 + $0x98] sm:$0xff] }
   0x6   :  { %59 = vmatpush.msra.mxu0 %v20_v4  ;;  %v37_v15 = vld [vmem:[%s254_s2 + $0x90] sm:$0xff]  ;;  %129 = vmatpush.msra.mxu3 %v38_v14  ;;  %v36_v16 = vld [vmem:[%s254_s2 + $0x88] sm:$0xff]  ;;  %v35_v17 = vld [vmem:[%s254_s2 + $0x80] sm:$0xff] }
   0x7   :  { %150 = vmatmul.msk.f32.vlgmr.msra.gmra.mxu0 %vm40_vm1, %v18_v6  ;;  %106 = vmatpush.msra.mxu2 %v28_v8  ;;  %v34_v18 = vld [vmem:[%s254_s2 + $0x78] sm:$0xff]  ;;  %v39_v19 = vld [vmem:[%s257_s3] sm:$0x7]  ;;  %v33_v26 = vld [vmem:[%s254_s2 + $0x70] sm:$0xff] }
   0x8   :  { %130 = vmatpush.msra.mxu3 %v37_v15  ;;  %v88_v21 = vperm.slane %v39_v19, 0  ;;  %v32_v27 = vld [vmem:[%s254_s2 + $0x68] sm:$0xff]  ;;  %v31_v28 = vld [vmem:[%s254_s2 + $0x60] sm:$0xff]  ;;  %v91_v29 = vperm.slane %v39_v19, 1  ;;  %v117_v33 = vperm.slane %v39_v19, 2 }
   0x9   :  { %107 = vmatpush.msra.mxu2 %v27_v9 }
   0xa   :  { %131 = vmatpush.msra.mxu3 %v36_v16 }
   0xb   :  { %108 = vmatpush.msra.mxu2 %v26_v10 }
   0xc   :  { %132 = vmatpush.msra.mxu3 %v35_v17 }
   0xd   :  { %109 = vmatpush.msra.mxu2 %v25_v11 }
   0xe   :  { %133 = vmatpush.msra.mxu3 %v34_v18 }
   0xf   :  { %110 = vmatpush.msra.mxu2 %v24_v12 }
  0x10   :  { %134 = vmatpush.msra.mxu3 %v33_v26 }
  0x11   :  { %111 = vmatpush.msra.mxu2 %v23_v13 }
  0x12   :  { %135 = vmatpush.msra.mxu3 %v32_v27 }
  0x14   :  { %136 = vmatpush.msra.mxu3 %v31_v28 }
  0x80   :  { %v85_v20 = vpop.f32.mrf.mxu1 }
  0x84   :  { %v61_v22 = vpop.f32.mrf.mxu0 }
  0x85   :  { %v86_v23 = vadd.f32 %v85_v20, %v61_v22 }
  0x87   :  { %v89_v24 = vadd.f32 %v88_v21, %v86_v23 }
  0x89   :  { %v90_v25 = vmax.f32 %v89_v24, 0.0 }
  0x8b   :  { %152 = vmatmul.msk.f32.vlgmr.msra.gmra.mxu2 %vm92_vm2, %v90_v25 }
 0x10e   :  { %v113_v30 = vpop.f32.mrf.mxu2 }
 0x10f   :  { %v114_v31 = vadd.f32 %v113_v30, %v91_v29 }
 0x111   :  { %v116_v32 = vmax.f32 %v114_v31, 0.0 }
 0x113   :  { %153 = vmatmul.msk.f32.vlgmr.msra.gmra.mxu3 %vm92_vm2, %v116_v32 }
 0x196   :  { %v138_v34 = vpop.f32.mrf.mxu3 }
 0x197   :  { %v139_v35 = vadd.f32 %v138_v34, %v117_v33 }
 0x199   :  { %v141_v36 = vsel %vm92_vm2, %v139_v35, inf }
 0x19a   :  { %142 = vmin.xlane.f32.xlu0 %v141_v36 }
 0x20d   :  { %v143_v37 = vpop.xlane.xlu0 %142 }
 0x20e   :  { %145 = vst.msk [vmem:[%s258_s4] sm:$0xff] %vm144_vm3, %v143_v37 }

</bundles_post_ra>
